<compile_context>
chip_gen: v7x
topology: tpu7x:2x2x1
jax: 0.10.0
libtpu: 0.0.40
codegen_flags: <defaults>
</compile_context>

<pallas_src>
import math

import jax
import jax.numpy as jnp
from jax import lax
from jax.experimental import pallas as pl
from jax.experimental.pallas import tpu as pltpu

_SQRT_HALF = 1.0 / math.sqrt(2.0)


def _exact_gelu(x):
    # PyTorch nn.GELU() default = exact erf-based GELU (computed in f32).
    return 0.5 * x * (1.0 + lax.erf(x * _SQRT_HALF))


def _projector_kernel(x_ref, w1_ref, b1_ref, w2_ref, b2_ref, w3_ref, b3_ref, o_ref):
    """One row tile: [tm, D_in] -> [tm, D_out_padded].

    Matmuls use MXU-native (bf16) operands with f32 accumulation; the bias
    adds and the exact GELU are done in f32.
    """
    mxu_dtype = w1_ref.dtype

    x = x_ref[...]                                           # [tm, D_in]

    # Linear 1 + GELU (f32 elementwise)
    h = jnp.dot(x, w1_ref[...], preferred_element_type=jnp.float32) + b1_ref[...]
    h = _exact_gelu(h)

    # Linear 2
    h = jnp.dot(h.astype(mxu_dtype), w2_ref[...],
                preferred_element_type=jnp.float32) + b2_ref[...]

    # Linear 3 (projection to padded output dim)
    y = jnp.dot(h.astype(mxu_dtype), w3_ref[...],
                preferred_element_type=jnp.float32) + b3_ref[...]

    o_ref[...] = y.astype(o_ref.dtype)


def _round_up(n, m):
    return ((n + m - 1) // m) * m


def _vmem_limit_bytes():
    """Generation-aware VMEM budget: ~8 MiB headroom, cap at ~100 MiB."""
    try:
        cap = pltpu.get_tpu_info().vmem_capacity_bytes
    except Exception:
        cap = 64 * 1024 * 1024  # conservative (v7x per-core VMEM)
    return max(32 * 1024 * 1024, min(cap - 8 * 1024 * 1024, 100 * 1024 * 1024))


def projector_forward(x, params, *, tm=256, compute_dtype=jnp.bfloat16):
    """x: [B, S, D_in] -> [B, S, D_out] (output keeps x.dtype)."""
    w1, b1, w2, b2, w3, b3 = params
    B, S, D_in = x.shape
    D_out = w3.shape[1]
    out_dtype = x.dtype

    M = B * S
    x2 = x.reshape(M, D_in)

    # ---- operand dtypes: MXU-native matmul operands, f32 bias/accumulation --
    cd = jnp.dtype(compute_dtype)
    x2 = x2.astype(cd)
    w1c, w2c, w3c = w1.astype(cd), w2.astype(cd), w3.astype(cd)
    b1c, b2c, b3c = (b1.astype(jnp.float32), b2.astype(jnp.float32),
                     b3.astype(jnp.float32))

    # ---- lane-dense output: pad output feature dim to a multiple of 128 -----
    D_out_p = _round_up(D_out, 128)
    if D_out_p != D_out:
        w3c = jnp.pad(w3c, ((0, 0), (0, D_out_p - D_out)))
        b3c = jnp.pad(b3c, ((0, 0), (0, D_out_p - D_out)))

    # ---- row tile: feed the MXU, but stay inside the VMEM budget ------------
    vmem_limit = _vmem_limit_bytes()
    cd_bytes = cd.itemsize
    out_bytes = jnp.dtype(out_dtype).itemsize

    tm = _round_up(max(tm, 8), 8)
    tm = min(tm, _round_up(M, 8))          # don't tile past a tiny problem

    # Conservative estimate: assume weights double-buffered (worst case).
    weight_bytes = 2 * (2 * D_in * D_in + D_in * D_out_p) * cd_bytes
    bias_bytes = 2 * (2 * D_in + D_out_p) * 4

    def _tile_bytes(t):
        return (2 * t * D_in * cd_bytes            # x tile (double-buffered)
                + 2 * t * D_out_p * out_bytes      # out tile (double-buffered)
                + 3 * t * D_in * 4)                # f32 intermediate h (+ temps)

    budget = int(0.85 * vmem_limit) - weight_bytes - bias_bytes
    while tm > 64 and _tile_bytes(tm) > max(budget, 0):
        tm //= 2
    # TODO(synk): for very wide D_in (weights alone >~48 MiB, e.g. 4096x4096 on
    # v7x) stream the weights over a K grid axis instead of keeping them
    # fully VMEM-resident.

    grid = (pl.cdiv(M, tm),)   # partial last block: OOB rows are write-masked

    cost = pl.CostEstimate(
        flops=2 * M * (2 * D_in * D_in + D_in * D_out_p),
        transcendentals=M * D_in,
        bytes_accessed=(M * D_in * cd_bytes
                        + (2 * D_in * D_in + D_in * D_out_p) * cd_bytes
                        + (2 * D_in + D_out_p) * 4
                        + M * D_out_p * out_bytes),
    )

    def _build_and_call(single_buffer_weights):
        def const_spec(shape):
            if single_buffer_weights:
                # Constant index_map => one resident VMEM buffer is enough.
                return pl.BlockSpec(shape, lambda i: (0, 0),
                                    pipeline_mode=pl.Buffered(1))
            return pl.BlockSpec(shape, lambda i: (0, 0))

        return pl.pallas_call(
            _projector_kernel,
            out_shape=jax.ShapeDtypeStruct((M, D_out_p), out_dtype),
            grid_spec=pltpu.PrefetchScalarGridSpec(
                num_scalar_prefetch=0,
                grid=grid,
                in_specs=[
                    pl.BlockSpec((tm, D_in), lambda i: (i, 0)),   # x row tile
                    const_spec((D_in, D_in)),                     # W1
                    const_spec((1, D_in)),                        # b1
                    const_spec((D_in, D_in)),                     # W2
                    const_spec((1, D_in)),                        # b2
                    const_spec((D_in, D_out_p)),                  # W3
                    const_spec((1, D_out_p)),                     # b3
                ],
                out_specs=pl.BlockSpec((tm, D_out_p), lambda i: (i, 0)),
            ),
            compiler_params=pltpu.CompilerParams(
                dimension_semantics=("parallel",),
                vmem_limit_bytes=vmem_limit,
            ),
            cost_estimate=cost,
        )(x2, w1c, b1c, w2c, b2c, w3c, b3c)

    try:
        out = _build_and_call(True)
    except Exception:
        # Some toolchain versions reject single-buffered constant blocks;
        # fall back to the default double-buffered pipeline.
        out = _build_and_call(False)

    if D_out_p != D_out:
        out = out[:, :D_out]
    return out.reshape(B, S, D_out)


def init_projector_params(key, input_dim, output_dim, dtype=jnp.float32):
    """Deterministic synthetic init (Kaiming-uniform-ish like nn.Linear)."""
    ks = jax.random.split(key, 6)

    def linear(kw, kb, fan_in, fan_out):
        bound = 1.0 / math.sqrt(fan_in)
        w = jax.random.uniform(kw, (fan_in, fan_out), dtype, -bound, bound)
        b = jax.random.uniform(kb, (1, fan_out), dtype, -bound, bound)
        return w, b

    w1, b1 = linear(ks[0], ks[1], input_dim, input_dim)
    w2, b2 = linear(ks[2], ks[3], input_dim, input_dim)
    w3, b3 = linear(ks[4], ks[5], input_dim, output_dim)
    return (w1, b1, w2, b2, w3, b3)


def projector_reference(x, params):
    """Pure-JAX f32 reference for correctness checking."""
    w1, b1, w2, b2, w3, b3 = params
    h = x.astype(jnp.float32) @ w1 + b1[0]
    h = _exact_gelu(h)
    h = h @ w2 + b2[0]
    return h @ w3 + b3[0]


if __name__ == "__main__":
    key = jax.random.PRNGKey(0)
    k_x, k_p = jax.random.split(key)

    B, S, D_in, D_out = 2, 8, 32, 64
    x = jax.random.normal(k_x, (B, S, D_in), jnp.float32)
    params = init_projector_params(k_p, D_in, D_out)

    y_ref = projector_reference(x, params)

    # f32 operand path: tight parity with the f32 reference.
    y_f32 = jax.block_until_ready(
        projector_forward(x, params, compute_dtype=jnp.float32))
    assert y_f32.shape == (B, S, D_out), y_f32.shape
    assert jnp.allclose(y_f32, y_ref, atol=2e-3, rtol=2e-3), \
        "f32 path mismatch vs reference"

    # Default (perf) path: bf16 MXU operands, f32 accumulation.
    y_bf16 = jax.block_until_ready(projector_forward(x, params))
    assert y_bf16.shape == (B, S, D_out), y_bf16.shape
    assert jnp.allclose(y_bf16, y_ref, atol=5e-2, rtol=5e-2), \
        "bf16 path mismatch vs reference"

    print("KERNEL_OK")
</pallas_src>

<mosaic_0001>
module attributes {stable_mosaic.version = 11 : i64} {
  func.func @_projector_kernel(%arg0: i32, %arg1: memref<16x32xf32, #tpu.memory_space<vmem>>, %arg2: memref<32x32xf32, #tpu.memory_space<vmem>>, %arg3: memref<1x32xf32, #tpu.memory_space<vmem>>, %arg4: memref<32x32xf32, #tpu.memory_space<vmem>>, %arg5: memref<1x32xf32, #tpu.memory_space<vmem>>, %arg6: memref<32x128xf32, #tpu.memory_space<vmem>>, %arg7: memref<1x128xf32, #tpu.memory_space<vmem>>, %arg8: memref<16x128xf32, #tpu.memory_space<vmem>>) attributes {dimension_semantics = [#tpu.dimension_semantics<parallel>], iteration_bounds = array<i64: 1>, scalar_prefetch = 0 : i64, scratch_operands = 0 : i64, tpu.core_type = #tpu.core_type<tc>, window_params = [{transform_indices = @transform_0, window_bounds = array<i64: 16, 32>}, {pipeline_mode = #tpu.pipeline_mode<synchronous>, transform_indices = @transform_1, window_bounds = array<i64: 32, 32>}, {pipeline_mode = #tpu.pipeline_mode<synchronous>, transform_indices = @transform_2, window_bounds = array<i64: 1, 32>}, {pipeline_mode = #tpu.pipeline_mode<synchronous>, transform_indices = @transform_3, window_bounds = array<i64: 32, 32>}, {pipeline_mode = #tpu.pipeline_mode<synchronous>, transform_indices = @transform_4, window_bounds = array<i64: 1, 32>}, {pipeline_mode = #tpu.pipeline_mode<synchronous>, transform_indices = @transform_5, window_bounds = array<i64: 32, 128>}, {pipeline_mode = #tpu.pipeline_mode<synchronous>, transform_indices = @transform_6, window_bounds = array<i64: 1, 128>}, {transform_indices = @transform_7, window_bounds = array<i64: 16, 128>}]} {
    %c0 = arith.constant 0 : index
    %c0_0 = arith.constant 0 : index
    %0 = vector.load %arg1[%c0, %c0_0] : memref<16x32xf32, #tpu.memory_space<vmem>>, vector<16x32xf32>
    %c0_1 = arith.constant 0 : index
    %c0_2 = arith.constant 0 : index
    %1 = vector.load %arg2[%c0_1, %c0_2] : memref<32x32xf32, #tpu.memory_space<vmem>>, vector<32x32xf32>
    %cst = arith.constant dense<0.000000e+00> : vector<16x32xf32>
    %2 = tpu.matmul %0, %1, %cst {dimension_numbers = #tpu.dot_dimension_numbers<[1], [0], [0], [1], [0, 0, 1, 1], [], []>} : vector<16x32xf32>, vector<32x32xf32>, vector<16x32xf32> -> vector<16x32xf32>
    %c0_3 = arith.constant 0 : index
    %c0_4 = arith.constant 0 : index
    %3 = vector.load %arg3[%c0_3, %c0_4] : memref<1x32xf32, #tpu.memory_space<vmem>>, vector<1x32xf32>
    %4 = vector.broadcast %3 : vector<1x32xf32> to vector<16x32xf32>
    %5 = arith.addf %2, %4 : vector<16x32xf32>
    %cst_5 = arith.constant 5.000000e-01 : f32
    %6 = vector.broadcast %cst_5 : f32 to vector<16x32xf32>
    %7 = arith.mulf %6, %5 : vector<16x32xf32>
    %cst_6 = arith.constant 0.707106769 : f32
    %8 = vector.broadcast %cst_6 : f32 to vector<16x32xf32>
    %9 = arith.mulf %5, %8 : vector<16x32xf32>
    %10 = math.erf %9 : vector<16x32xf32>
    %cst_7 = arith.constant 1.000000e+00 : f32
    %11 = vector.broadcast %cst_7 : f32 to vector<16x32xf32>
    %12 = arith.addf %11, %10 : vector<16x32xf32>
    %13 = arith.mulf %7, %12 : vector<16x32xf32>
    %c0_8 = arith.constant 0 : index
    %c0_9 = arith.constant 0 : index
    %14 = vector.load %arg4[%c0_8, %c0_9] : memref<32x32xf32, #tpu.memory_space<vmem>>, vector<32x32xf32>
    %cst_10 = arith.constant dense<0.000000e+00> : vector<16x32xf32>
    %15 = tpu.matmul %13, %14, %cst_10 {dimension_numbers = #tpu.dot_dimension_numbers<[1], [0], [0], [1], [0, 0, 1, 1], [], []>} : vector<16x32xf32>, vector<32x32xf32>, vector<16x32xf32> -> vector<16x32xf32>
    %c0_11 = arith.constant 0 : index
    %c0_12 = arith.constant 0 : index
    %16 = vector.load %arg5[%c0_11, %c0_12] : memref<1x32xf32, #tpu.memory_space<vmem>>, vector<1x32xf32>
    %17 = vector.broadcast %16 : vector<1x32xf32> to vector<16x32xf32>
    %18 = arith.addf %15, %17 : vector<16x32xf32>
    %c0_13 = arith.constant 0 : index
    %c0_14 = arith.constant 0 : index
    %19 = vector.load %arg6[%c0_13, %c0_14] : memref<32x128xf32, #tpu.memory_space<vmem>>, vector<32x128xf32>
    %cst_15 = arith.constant dense<0.000000e+00> : vector<16x128xf32>
    %20 = tpu.matmul %18, %19, %cst_15 {dimension_numbers = #tpu.dot_dimension_numbers<[1], [0], [0], [1], [0, 0, 1, 1], [], []>} : vector<16x32xf32>, vector<32x128xf32>, vector<16x128xf32> -> vector<16x128xf32>
    %c0_16 = arith.constant 0 : index
    %c0_17 = arith.constant 0 : index
    %21 = vector.load %arg7[%c0_16, %c0_17] : memref<1x128xf32, #tpu.memory_space<vmem>>, vector<1x128xf32>
    %22 = vector.broadcast %21 : vector<1x128xf32> to vector<16x128xf32>
    %23 = arith.addf %20, %22 : vector<16x128xf32>
    %c0_18 = arith.constant 0 : index
    %c0_19 = arith.constant 0 : index
    %24 = vector.load %arg8[%c0_18, %c0_19] : memref<16x128xf32, #tpu.memory_space<vmem>>, vector<16x128xf32>
    tpu.vector_store %arg8[%c0_18, %c0_19], %23 {strides = array<i32>} : memref<16x128xf32, #tpu.memory_space<vmem>>, vector<16x128xf32>,
    return
  }
  func.func @transform_0(%arg0: i32) -> (i32, i32) {
    %c0_i32 = arith.constant 0 : i32
    %c0_i32_0 = arith.constant 0 : i32
    return %arg0, %c0_i32 : i32, i32
  }
  func.func @transform_1(%arg0: i32) -> (i32, i32) {
    %c0_i32 = arith.constant 0 : i32
    %c0_i32_0 = arith.constant 0 : i32
    %c0_i32_1 = arith.constant 0 : i32
    return %c0_i32, %c0_i32_0 : i32, i32
  }
  func.func @transform_2(%arg0: i32) -> (i32, i32) {
    %c0_i32 = arith.constant 0 : i32
    %c0_i32_0 = arith.constant 0 : i32
    %c0_i32_1 = arith.constant 0 : i32
    return %c0_i32, %c0_i32_0 : i32, i32
  }
  func.func @transform_3(%arg0: i32) -> (i32, i32) {
    %c0_i32 = arith.constant 0 : i32
    %c0_i32_0 = arith.constant 0 : i32
    %c0_i32_1 = arith.constant 0 : i32
    return %c0_i32, %c0_i32_0 : i32, i32
  }
  func.func @transform_4(%arg0: i32) -> (i32, i32) {
    %c0_i32 = arith.constant 0 : i32
    %c0_i32_0 = arith.constant 0 : i32
    %c0_i32_1 = arith.constant 0 : i32
    return %c0_i32, %c0_i32_0 : i32, i32
  }
  func.func @transform_5(%arg0: i32) -> (i32, i32) {
    %c0_i32 = arith.constant 0 : i32
    %c0_i32_0 = arith.constant 0 : i32
    %c0_i32_1 = arith.constant 0 : i32
    return %c0_i32, %c0_i32_0 : i32, i32
  }
  func.func @transform_6(%arg0: i32) -> (i32, i32) {
    %c0_i32 = arith.constant 0 : i32
    %c0_i32_0 = arith.constant 0 : i32
    %c0_i32_1 = arith.constant 0 : i32
    return %c0_i32, %c0_i32_0 : i32, i32
  }
  func.func @transform_7(%arg0: i32) -> (i32, i32) {
    %c0_i32 = arith.constant 0 : i32
    %c0_i32_0 = arith.constant 0 : i32
    return %arg0, %c0_i32 : i32, i32
  }
}

module attributes {stable_mosaic.version = 11 : i64} {
  func.func @_projector_kernel(%arg0: i32, %arg1: memref<16x32xf32, #tpu.memory_space<vmem>>, %arg2: memref<32x32xf32, #tpu.memory_space<vmem>>, %arg3: memref<1x32xf32, #tpu.memory_space<vmem>>, %arg4: memref<32x32xf32, #tpu.memory_space<vmem>>, %arg5: memref<1x32xf32, #tpu.memory_space<vmem>>, %arg6: memref<32x128xf32, #tpu.memory_space<vmem>>, %arg7: memref<1x128xf32, #tpu.memory_space<vmem>>, %arg8: memref<16x128xf32, #tpu.memory_space<vmem>>) attributes {dimension_semantics = [#tpu.dimension_semantics<parallel>], iteration_bounds = array<i64: 1>, scalar_prefetch = 0 : i64, scratch_operands = 0 : i64, tpu.core_type = #tpu.core_type<tc>, window_params = [{transform_indices = @transform_0, window_bounds = array<i64: 16, 32>}, {pipeline_mode = #tpu.pipeline_mode<synchronous>, transform_indices = @transform_1, window_bounds = array<i64: 32, 32>}, {pipeline_mode = #tpu.pipeline_mode<synchronous>, transform_indices = @transform_2, window_bounds = array<i64: 1, 32>}, {pipeline_mode = #tpu.pipeline_mode<synchronous>, transform_indices = @transform_3, window_bounds = array<i64: 32, 32>}, {pipeline_mode = #tpu.pipeline_mode<synchronous>, transform_indices = @transform_4, window_bounds = array<i64: 1, 32>}, {pipeline_mode = #tpu.pipeline_mode<synchronous>, transform_indices = @transform_5, window_bounds = array<i64: 32, 128>}, {pipeline_mode = #tpu.pipeline_mode<synchronous>, transform_indices = @transform_6, window_bounds = array<i64: 1, 128>}, {transform_indices = @transform_7, window_bounds = array<i64: 16, 128>}]} {
    %c0 = arith.constant 0 : index
    %c0_0 = arith.constant 0 : index
    %0 = vector.load %arg1[%c0, %c0_0] : memref<16x32xf32, #tpu.memory_space<vmem>>, vector<16x32xf32>
    %c0_1 = arith.constant 0 : index
    %c0_2 = arith.constant 0 : index
    %1 = vector.load %arg2[%c0_1, %c0_2] : memref<32x32xf32, #tpu.memory_space<vmem>>, vector<32x32xf32>
    %cst = arith.constant dense<0.000000e+00> : vector<16x32xf32>
    %2 = tpu.matmul %0, %1, %cst {dimension_numbers = #tpu.dot_dimension_numbers<[1], [0], [0], [1], [0, 0, 1, 1], [], []>} : vector<16x32xf32>, vector<32x32xf32>, vector<16x32xf32> -> vector<16x32xf32>
    %c0_3 = arith.constant 0 : index
    %c0_4 = arith.constant 0 : index
    %3 = vector.load %arg3[%c0_3, %c0_4] : memref<1x32xf32, #tpu.memory_space<vmem>>, vector<1x32xf32>
    %4 = vector.broadcast %3 : vector<1x32xf32> to vector<16x32xf32>
    %5 = arith.addf %2, %4 : vector<16x32xf32>
    %cst_5 = arith.constant 5.000000e-01 : f32
    %6 = vector.broadcast %cst_5 : f32 to vector<16x32xf32>
    %7 = arith.mulf %6, %5 : vector<16x32xf32>
    %cst_6 = arith.constant 0.707106769 : f32
    %8 = vector.broadcast %cst_6 : f32 to vector<16x32xf32>
    %9 = arith.mulf %5, %8 : vector<16x32xf32>
    %10 = math.erf %9 : vector<16x32xf32>
    %cst_7 = arith.constant 1.000000e+00 : f32
    %11 = vector.broadcast %cst_7 : f32 to vector<16x32xf32>
    %12 = arith.addf %11, %10 : vector<16x32xf32>
    %13 = arith.mulf %7, %12 : vector<16x32xf32>
    %c0_8 = arith.constant 0 : index
    %c0_9 = arith.constant 0 : index
    %14 = vector.load %arg4[%c0_8, %c0_9] : memref<32x32xf32, #tpu.memory_space<vmem>>, vector<32x32xf32>
    %cst_10 = arith.constant dense<0.000000e+00> : vector<16x32xf32>
    %15 = tpu.matmul %13, %14, %cst_10 {dimension_numbers = #tpu.dot_dimension_numbers<[1], [0], [0], [1], [0, 0, 1, 1], [], []>} : vector<16x32xf32>, vector<32x32xf32>, vector<16x32xf32> -> vector<16x32xf32>
    %c0_11 = arith.constant 0 : index
    %c0_12 = arith.constant 0 : index
    %16 = vector.load %arg5[%c0_11, %c0_12] : memref<1x32xf32, #tpu.memory_space<vmem>>, vector<1x32xf32>
    %17 = vector.broadcast %16 : vector<1x32xf32> to vector<16x32xf32>
    %18 = arith.addf %15, %17 : vector<16x32xf32>
    %c0_13 = arith.constant 0 : index
    %c0_14 = arith.constant 0 : index
    %19 = vector.load %arg6[%c0_13, %c0_14] : memref<32x128xf32, #tpu.memory_space<vmem>>, vector<32x128xf32>
    %cst_15 = arith.constant dense<0.000000e+00> : vector<16x128xf32>
    %20 = tpu.matmul %18, %19, %cst_15 {dimension_numbers = #tpu.dot_dimension_numbers<[1], [0], [0], [1], [0, 0, 1, 1], [], []>} : vector<16x32xf32>, vector<32x128xf32>, vector<16x128xf32> -> vector<16x128xf32>
    %c0_16 = arith.constant 0 : index
    %c0_17 = arith.constant 0 : index
    %21 = vector.load %arg7[%c0_16, %c0_17] : memref<1x128xf32, #tpu.memory_space<vmem>>, vector<1x128xf32>
    %22 = vector.broadcast %21 : vector<1x128xf32> to vector<16x128xf32>
    %23 = arith.addf %20, %22 : vector<16x128xf32>
    %c0_18 = arith.constant 0 : index
    %c0_19 = arith.constant 0 : index
    %24 = vector.load %arg8[%c0_18, %c0_19] : memref<16x128xf32, #tpu.memory_space<vmem>>, vector<16x128xf32>
    tpu.vector_store %arg8[%c0_18, %c0_19], %23 {strides = array<i32>} : memref<16x128xf32, #tpu.memory_space<vmem>>, vector<16x128xf32>,
    return
  }
  func.func @transform_0(%arg0: i32) -> (i32, i32) {
    %c0_i32 = arith.constant 0 : i32
    %c0_i32_0 = arith.constant 0 : i32
    return %arg0, %c0_i32 : i32, i32
  }
  func.func @transform_1(%arg0: i32) -> (i32, i32) {
    %c0_i32 = arith.constant 0 : i32
    %c0_i32_0 = arith.constant 0 : i32
    %c0_i32_1 = arith.constant 0 : i32
    return %c0_i32, %c0_i32_0 : i32, i32
  }
  func.func @transform_2(%arg0: i32) -> (i32, i32) {
    %c0_i32 = arith.constant 0 : i32
    %c0_i32_0 = arith.constant 0 : i32
    %c0_i32_1 = arith.constant 0 : i32
    return %c0_i32, %c0_i32_0 : i32, i32
  }
  func.func @transform_3(%arg0: i32) -> (i32, i32) {
    %c0_i32 = arith.constant 0 : i32
    %c0_i32_0 = arith.constant 0 : i32
    %c0_i32_1 = arith.constant 0 : i32
    return %c0_i32, %c0_i32_0 : i32, i32
  }
  func.func @transform_4(%arg0: i32) -> (i32, i32) {
    %c0_i32 = arith.constant 0 : i32
    %c0_i32_0 = arith.constant 0 : i32
    %c0_i32_1 = arith.constant 0 : i32
    return %c0_i32, %c0_i32_0 : i32, i32
  }
  func.func @transform_5(%arg0: i32) -> (i32, i32) {
    %c0_i32 = arith.constant 0 : i32
    %c0_i32_0 = arith.constant 0 : i32
    %c0_i32_1 = arith.constant 0 : i32
    return %c0_i32, %c0_i32_0 : i32, i32
  }
  func.func @transform_6(%arg0: i32) -> (i32, i32) {
    %c0_i32 = arith.constant 0 : i32
    %c0_i32_0 = arith.constant 0 : i32
    %c0_i32_1 = arith.constant 0 : i32
    return %c0_i32, %c0_i32_0 : i32, i32
  }
  func.func @transform_7(%arg0: i32) -> (i32, i32) {
    %c0_i32 = arith.constant 0 : i32
    %c0_i32_0 = arith.constant 0 : i32
    return %arg0, %c0_i32 : i32, i32
  }
}

</mosaic_0001>

<bundles_post_ra>
// kernel: tpu_custom_call.1
= control target key start
LH: loop header
LB: loop body
LE: loop exit
PB: predicated region body
PF: predicated region fallthrough
CT: control target
= control target key end

     0   :  { %12 = vsyncpa [#allocation3], 0  ;;  %s756_s0 = inlined_call_operand.hbm [shape: f32[16,32], index: 0, kind: input, shape index: {}]   ;;  %s757_s1 = inlined_call_operand.hbm [shape: f32[32,32], index: 1, kind: input, shape index: {}]   ;;  %s758_s2 = inlined_call_operand.vmem [shape: f32[1,32], index: 2, kind: input, shape index: {}]   ;;  %s759_s3 = inlined_call_operand.hbm [shape: f32[32,32], index: 3, kind: input, shape index: {}]   ;;  %s760_s4 = inlined_call_operand.vmem [shape: f32[1,32], index: 4, kind: input, shape index: {}]   ;;  %s761_s5 = inlined_call_operand.hbm [shape: f32[32,128], index: 5, kind: input, shape index: {}]   ;;  %s762_s6 = inlined_call_operand.vmem [shape: f32[1,128], index: 6, kind: input, shape index: {}]   ;;  %s763_s7 = inlined_call_operand.hbm [shape: f32[16,128], index: 7, kind: output, shape index: {}]  }
   0x1   :  { %13 = vsyncpa [#allocation6], 0 }
   0x2   :  { %14 = vsyncpa [#allocation9], 0 }
   0x3   :  { %15 = vsyncpa [#allocation4], 0  ;;  %s605_s24 = smov [#allocation5]   ;;  %s606_s26 = smov [#allocation2]  }
   0x4   :  { %s33_s25 = sshll.u32 %s605_s24, 4  ;;  %s21_s27 = sshll.u32 %s606_s26, 4  ;;  %s34_s25 = int_to_ptr.vmem [resolvable:$true] %s33_s25  ;;  %s652_s27 = int_to_ptr.vmem [resolvable:$true] %s21_s27 }
   0x5   :  { %s487_s30 = scalar_lea.hbm %s757_s1, 512 }
   0x6   :  { %p488_p0 = scmp.ne.s32.totalorder %s757_s1, %s487_s30  ;;  %p491_p1 = scmp.lt.u32.totalorder %s487_s30, %s757_s1 }
   0x8   :  { %p493_p2 = pnand %p491_p1, %p488_p0 }
   0xa   :  { %496 = shalt.err (!%p493_p2)
}
   0xb   :  { %s497_s12 = scalar_lea.vmem %s34_s25, 512  ;;  %p502_p4 = scmp.lt.s32.totalorder %s34_s25, %s34_s25 }
   0xc   :  { %p498_p3 = scmp.ne.s32.totalorder %s34_s25, %s497_s12  ;;  %p503_p5 = scmp.lt.s32.totalorder %s497_s12, %s497_s12 }
   0xe   :  { %p504_p6 = por %p503_p5, %p502_p4 }
  0x10   :  { %p505_p7 = pnand %p504_p6, %p498_p3 }
  0x12   :  { %508 = shalt.err (!%p505_p7)
}
  0x13   :  { %s607_s13 = smov 128   ;;  %s608_s14 = smov 8  }
  0x14   :  { %39 = dma.hbm_to_vmem [thread:$0]  %s757_s1, 512, %s34_s25, [#allocation6], %s607_s13, %s607_s13, %s608_s14  }
  0x15   :  { %s509_s19 = scalar_lea.hbm %s756_s0, 256 }
  0x16   :  { %p510_p8 = scmp.ne.s32.totalorder %s756_s0, %s509_s19  ;;  %p513_p9 = scmp.lt.u32.totalorder %s509_s19, %s756_s0 }
  0x18   :  { %p515_p10 = pnand %p513_p9, %p510_p8 }
  0x1a   :  { %518 = shalt.err (!%p515_p10)
}
  0x1b   :  { %s519_s24 = scalar_lea.vmem %s652_s27, 256  ;;  %p524_p12 = scmp.lt.s32.totalorder %s652_s27, %s652_s27 }
  0x1c   :  { %p520_p11 = scmp.ne.s32.totalorder %s652_s27, %s519_s24  ;;  %p525_p13 = scmp.lt.s32.totalorder %s519_s24, %s519_s24 }
  0x1e   :  { %p526_p0 = por %p525_p13, %p524_p12 }
  0x20   :  { %p527_p1 = pnand %p526_p0, %p520_p11 }
  0x22   :  { %530 = shalt.err (!%p527_p1)
}
  0x23   :  { %27 = dma.hbm_to_vmem [thread:$0]  %s756_s0, 256, %s652_s27, [#allocation3], %s607_s13, %s607_s13, %s608_s14  }
  0x24   :  { %s609_s26 = smov [#allocation7]   ;;  %s610_s29 = smov [#allocation8]  }
  0x25   :  { %s47_s28 = sshll.u32 %s609_s26, 4  ;;  %s61_s30 = sshll.u32 %s610_s29, 4  ;;  %s48_s28 = int_to_ptr.vmem [resolvable:$true] %s47_s28  ;;  %s689_s30 = int_to_ptr.vmem [resolvable:$true] %s61_s30 }
  0x26   :  { %s531_s10 = scalar_lea.hbm %s759_s3, 512 }
  0x27   :  { %p532_p2 = scmp.ne.s32.totalorder %s759_s3, %s531_s10  ;;  %p535_p3 = scmp.lt.u32.totalorder %s531_s10, %s759_s3 }
  0x29   :  { %p537_p4 = pnand %p535_p3, %p532_p2 }
  0x2b   :  { %540 = shalt.err (!%p537_p4)
}
  0x2c   :  { %s541_s0 = scalar_lea.vmem %s48_s28, 512  ;;  %p546_p6 = scmp.lt.s32.totalorder %s48_s28, %s48_s28 }
  0x2d   :  { %p542_p5 = scmp.ne.s32.totalorder %s48_s28, %s541_s0  ;;  %p547_p7 = scmp.lt.s32.totalorder %s541_s0, %s541_s0 }
  0x2f   :  { %p548_p8 = por %p547_p7, %p546_p6 }
  0x31   :  { %p549_p9 = pnand %p548_p8, %p542_p5 }
  0x33   :  { %552 = shalt.err (!%p549_p9)
}
  0x34   :  { %53 = dma.hbm_to_vmem [thread:$0]  %s759_s3, 512, %s48_s28, [#allocation6], %s607_s13, %s607_s13, %s608_s14  }
  0x35   :  { %s553_s20 = scalar_lea.hbm %s761_s5, 512 }
  0x36   :  { %p554_p10 = scmp.ne.s32.totalorder %s761_s5, %s553_s20  ;;  %p557_p11 = scmp.lt.u32.totalorder %s553_s20, %s761_s5 }
  0x38   :  { %p559_p12 = pnand %p557_p11, %p554_p10 }
  0x3a   :  { %562 = shalt.err (!%p559_p12)
}
  0x3b   :  { %s563_s1 = scalar_lea.vmem %s689_s30, 512  ;;  %p568_p0 = scmp.lt.s32.totalorder %s689_s30, %s689_s30 }
  0x3c   :  { %p564_p13 = scmp.ne.s32.totalorder %s689_s30, %s563_s1  ;;  %p569_p1 = scmp.lt.s32.totalorder %s563_s1, %s563_s1 }
  0x3e   :  { %p570_p2 = por %p569_p1, %p568_p0 }
  0x40   :  { %p571_p3 = pnand %p570_p2, %p564_p13 }
  0x42   :  { %574 = shalt.err (!%p571_p3)
}
  0x43   :  { %67 = dma.hbm_to_vmem [thread:$0]  %s761_s5, 512, %s689_s30, [#allocation9], %s607_s13, %s607_s13, %s608_s14  }
  0x44   :  { %597 = dma.done.wait [#allocation3], 256  }
  0x45   :  { %598 = vsyncadd [#allocation3], 4294967040 }
  0x46   :  { %599 = dma.done.wait [#allocation6], 1024  }
  0x47   :  { %600 = vsyncadd [#allocation6], 4294966272 }
  0x48   :  { %601 = dma.done.wait [#allocation9], 512  }
  0x49   :  { %602 = vsyncadd [#allocation9], 4294966784  ;;  %vm95_vm0 = vcmask 261120   ;;  %v84_v0 = vld [vmem:[#allocation5] sm:$0xff]  ;;  %v85_v1 = vld [vmem:[#allocation5 + $0x8] sm:$0xff]  ;;  %s611_s8 = smov [#allocation10]  }
  0x4a   :  { %v86_v2 = vld [vmem:[#allocation5 + $0x10] sm:$0xff]  ;;  %v452_v3 = vpack.c.bf16 %v85_v1, %v84_v0  ;;  %v87_v4 = vld [vmem:[#allocation5 + $0x18] sm:$0xff]  ;;  %v187_v8 = vld [vmem:[#allocation7] sm:$0xff]  ;;  %s378_s9 = sshll.u32 %s611_s8, 4  ;;  %s379_s9 = int_to_ptr.vmem [resolvable:$true] %s378_s9 }
  0x4b   :  { %v82_v5 = vld [vmem:[#allocation2] sm:$0xff]  ;;  %v456_v6 = vpack.c.bf16 %v87_v4, %v86_v2  ;;  %v83_v7 = vld [vmem:[#allocation2 + $0x8] sm:$0xff]  ;;  %v188_v9 = vld [vmem:[#allocation7 + $0x8] sm:$0xff]  ;;  %p580_p5 = scmp.lt.s32.totalorder %s379_s9, %s379_s9 }
  0x4c   :  { %427 = vmatprep.mubr.msk.f32.mxu0 %vm95_vm0, %v82_v5  ;;  %453 = vmatprep.subr.bf16.mxu0 %v452_v3  ;;  %v460_v10 = vpack.c.bf16 %v188_v9, %v187_v8  ;;  %v189_v11 = vld [vmem:[#allocation7 + $0x10] sm:$0xff]  ;;  %v190_v12 = vld [vmem:[#allocation7 + $0x18] sm:$0xff]  ;;  %v279_v14 = vld [vmem:[#allocation8] sm:$0xff] }
  0x4d   :  { %455 = vmatpush3.bf16.msra.mxu0 %v452_v3  ;;  %v464_v13 = vpack.c.bf16 %v190_v12, %v189_v11  ;;  %v280_v15 = vld [vmem:[#allocation8 + $0x8] sm:$0xff]  ;;  %v392_v17 = vld [vmem:[%s758_s2] ss:$0 sm:$0xff]  ;;  %v282_v33 = vld [vmem:[#allocation8 + $0x18] sm:$0xff] }
  0x4e   :  { %457 = vmatprep.subr.bf16.mxu0 %v456_v6  ;;  %461 = vmatprep.subr.bf16.mxu1 %v460_v10  ;;  %v468_v16 = vpack.c.bf16 %v280_v15, %v279_v14  ;;  %v281_v32 = vld [vmem:[#allocation8 + $0x10] sm:$0xff] }
  0x4f   :  { %463 = vmatpush3.bf16.msra.mxu1 %v460_v10  ;;  %v472_v34 = vpack.c.bf16 %v282_v33, %v281_v32  ;;  %v395_v35 = vld [vmem:[%s760_s4] ss:$0 sm:$0xff]  ;;  %s575_s4 = scalar_lea.vmem %s379_s9, 256 }
  0x50   :  { %465 = vmatprep.subr.bf16.mxu1 %v464_v13  ;;  %v398_v40 = vld [vmem:[%s762_s6] ss:$0 sm:$0xff]  ;;  %p576_p4 = scmp.ne.s32.totalorder %s379_s9, %s575_s4  ;;  %p581_p6 = scmp.lt.s32.totalorder %s575_s4, %s575_s4 }
  0x51   :  { %459 = vmatpush3.bf16.msra.mxu0 %v456_v6 }
  0x52   :  { %469 = vmatprep.subr.bf16.mxu0 %v468_v16  ;;  %p582_p7 = por %p581_p6, %p580_p5 }
  0x53   :  { %467 = vmatpush3.bf16.msra.mxu1 %v464_v13 }
  0x54   :  { %428 = vmatmul.mubr.msk.f32.vlgmr.msra.gmra.mrb[0].mxu0 %vm95_vm0, %v83_v7  ;;  %p583_p8 = pnand %p582_p7, %p576_p4 }
  0x55   :  { %471 = vmatpush3.bf16.msra.mxu0 %v468_v16 }
  0x56   :  { %473 = vmatprep.subr.bf16.mxu0 %v472_v34 }
  0x59   :  { %475 = vmatpush3.bf16.msra.mxu0 %v472_v34 }
 0x127   :  { %v429_v18 = vpop.f32.mrb[0].mxu0 }
 0x128   :  { %v174_v19 = vadd.f32 %v429_v18, %v392_v17  ;;  %v168_v20 = vpop.f32.mrb[1].mxu0 }
 0x129   :  { %v169_v21 = vadd.f32 %v392_v17, %v168_v20 }
 0x12a   :  { %v180_v22 = vmul.f32 0.70710677, %v174_v19  ;;  %v178_v29 = vmul.f32 0.5, %v174_v19 }
 0x12b   :  { %v179_v23 = vmul.f32 0.70710677, %v169_v21  ;;  %v177_v27 = vmul.f32 0.5, %v169_v21 }
 0x12c   :  { %483 = verf.f32 %v180_v22 }
 0x12d   :  { %485 = verf.f32 %v179_v23 }
 0x136   :  { %v484_v24 = vpop.eup %483 }
 0x137   :  { %v486_v25 = vpop.eup %485  ;;  %v184_v26 = vadd.f32 1.0, %v484_v24 }
 0x138   :  { %v183_v28 = vadd.f32 1.0, %v486_v25 }
 0x139   :  { %v186_v31 = vmul.f32 %v184_v26, %v178_v29 }
 0x13a   :  { %v185_v30 = vmul.f32 %v183_v28, %v177_v27 }
 0x13c   :  { %438 = vmatprep.mubr.msk.f32.mxu1 %vm95_vm0, %v185_v30 }
 0x13d   :  { %439 = vmatmul.mubr.msk.f32.vlgmr.msra.gmra.mrb[0].mxu1 %vm95_vm0, %v186_v31 }
 0x210   :  { %v440_v36 = vpop.f32.mrb[0].mxu1 }
 0x211   :  { %v270_v37 = vpop.f32.mrb[1].mxu1  ;;  %v276_v39 = vadd.f32 %v440_v36, %v395_v35 }
 0x212   :  { %v271_v38 = vadd.f32 %v395_v35, %v270_v37 }
 0x214   :  { %449 = vmatprep.mubr.msk.f32.mxu0 %vm95_vm0, %v271_v38 }
 0x215   :  { %450 = vmatmul.mubr.msk.f32.vlgmr.msra.gmra.mrb[2].mxu0 %vm95_vm0, %v276_v39 }
 0x2e8   :  { %v451_v41 = vpop.f32.mrb[2].mxu0 }
 0x2e9   :  { %v368_v42 = vadd.f32 %v451_v41, %v398_v40  ;;  %v362_v43 = vpop.f32.mrb[3].mxu0 }
 0x2ea   :  { %v363_v44 = vadd.f32 %v398_v40, %v362_v43 }
 0x2eb   :  { %372 = vst [vmem:[#allocation10 + $0x8] sm:$0xff] %v368_v42 }
 0x2ec   :  { %371 = vst [vmem:[#allocation10] sm:$0xff] %v363_v44 }
 0x2ed   :  { %586 = shalt.err (!%p583_p8)
}
 0x2ee   :  { %s587_s6 = scalar_lea.hbm %s763_s7, 256 }
 0x2ef   :  { %p588_p9 = scmp.ne.s32.totalorder %s763_s7, %s587_s6  ;;  %p591_p10 = scmp.lt.u32.totalorder %s587_s6, %s763_s7 }
 0x2f1   :  { %p593_p11 = pnand %p591_p10, %p588_p9 }
 0x2f3   :  { %596 = shalt.err (!%p593_p11)
}
 0x2f4   :  { %384 = dma.vmem_to_hbm [thread:$0]  %s379_s9, 256, %s763_s7, [#allocation4], %s607_s13, %s607_s13, %s608_s14  }
 0x2f5   :  { %603 = dma.done.wait [#allocation4], 256  }
 0x2f6   :  { %604 = vsyncadd [#allocation4], 4294967040 }
 0x2f7   :  { %388 = vsyncpa [#allocation3], 1 }
 0x2f8   :  { %389 = vsyncpa [#allocation6], 1 }
 0x2f9   :  { %390 = vsyncpa [#allocation9], 1 }
 0x2fa   :  { %391 = vsyncpa [#allocation4], 1 }

// kernel: tpu_custom_call.1
= control target key start
LH: loop header
LB: loop body
LE: loop exit
PB: predicated region body
PF: predicated region fallthrough
CT: control target
= control target key end

     0   :  { %12 = vsyncpa [#allocation3], 0  ;;  %s756_s0 = inlined_call_operand.hbm [shape: f32[16,32], index: 0, kind: input, shape index: {}]   ;;  %s757_s1 = inlined_call_operand.hbm [shape: f32[32,32], index: 1, kind: input, shape index: {}]   ;;  %s758_s2 = inlined_call_operand.vmem [shape: f32[1,32], index: 2, kind: input, shape index: {}]   ;;  %s759_s3 = inlined_call_operand.hbm [shape: f32[32,32], index: 3, kind: input, shape index: {}]   ;;  %s760_s4 = inlined_call_operand.vmem [shape: f32[1,32], index: 4, kind: input, shape index: {}]   ;;  %s761_s5 = inlined_call_operand.hbm [shape: f32[32,128], index: 5, kind: input, shape index: {}]   ;;  %s762_s6 = inlined_call_operand.vmem [shape: f32[1,128], index: 6, kind: input, shape index: {}]   ;;  %s763_s7 = inlined_call_operand.hbm [shape: f32[16,128], index: 7, kind: output, shape index: {}]  }
   0x1   :  { %13 = vsyncpa [#allocation6], 0 }
   0x2   :  { %14 = vsyncpa [#allocation9], 0 }
   0x3   :  { %15 = vsyncpa [#allocation4], 0  ;;  %s605_s24 = smov [#allocation5]   ;;  %s606_s26 = smov [#allocation2]  }
   0x4   :  { %s33_s25 = sshll.u32 %s605_s24, 4  ;;  %s21_s27 = sshll.u32 %s606_s26, 4  ;;  %s34_s25 = int_to_ptr.vmem [resolvable:$true] %s33_s25  ;;  %s652_s27 = int_to_ptr.vmem [resolvable:$true] %s21_s27 }
   0x5   :  { %s487_s30 = scalar_lea.hbm %s757_s1, 512 }
   0x6   :  { %p488_p0 = scmp.ne.s32.totalorder %s757_s1, %s487_s30  ;;  %p491_p1 = scmp.lt.u32.totalorder %s487_s30, %s757_s1 }
   0x8   :  { %p493_p2 = pnand %p491_p1, %p488_p0 }
   0xa   :  { %496 = shalt.err (!%p493_p2)
}
   0xb   :  { %s497_s12 = scalar_lea.vmem %s34_s25, 512  ;;  %p502_p4 = scmp.lt.s32.totalorder %s34_s25, %s34_s25 }
   0xc   :  { %p498_p3 = scmp.ne.s32.totalorder %s34_s25, %s497_s12  ;;  %p503_p5 = scmp.lt.s32.totalorder %s497_s12, %s497_s12 }
   0xe   :  { %p504_p6 = por %p503_p5, %p502_p4 }
  0x10   :  { %p505_p7 = pnand %p504_p6, %p498_p3 }
  0x12   :  { %508 = shalt.err (!%p505_p7)
}
  0x13   :  { %s607_s13 = smov 128   ;;  %s608_s14 = smov 8  }
  0x14   :  { %39 = dma.hbm_to_vmem [thread:$0]  %s757_s1, 512, %s34_s25, [#allocation6], %s607_s13, %s607_s13, %s608_s14  }
  0x15   :  { %s509_s19 = scalar_lea.hbm %s756_s0, 256 }
  0x16   :  { %p510_p8 = scmp.ne.s32.totalorder %s756_s0, %s509_s19  ;;  %p513_p9 = scmp.lt.u32.totalorder %s509_s19, %s756_s0 }
  0x18   :  { %p515_p10 = pnand %p513_p9, %p510_p8 }
  0x1a   :  { %518 = shalt.err (!%p515_p10)
}
  0x1b   :  { %s519_s24 = scalar_lea.vmem %s652_s27, 256  ;;  %p524_p12 = scmp.lt.s32.totalorder %s652_s27, %s652_s27 }
  0x1c   :  { %p520_p11 = scmp.ne.s32.totalorder %s652_s27, %s519_s24  ;;  %p525_p13 = scmp.lt.s32.totalorder %s519_s24, %s519_s24 }
  0x1e   :  { %p526_p0 = por %p525_p13, %p524_p12 }
  0x20   :  { %p527_p1 = pnand %p526_p0, %p520_p11 }
  0x22   :  { %530 = shalt.err (!%p527_p1)
}
  0x23   :  { %27 = dma.hbm_to_vmem [thread:$0]  %s756_s0, 256, %s652_s27, [#allocation3], %s607_s13, %s607_s13, %s608_s14  }
  0x24   :  { %s609_s26 = smov [#allocation7]   ;;  %s610_s29 = smov [#allocation8]  }
  0x25   :  { %s47_s28 = sshll.u32 %s609_s26, 4  ;;  %s61_s30 = sshll.u32 %s610_s29, 4  ;;  %s48_s28 = int_to_ptr.vmem [resolvable:$true] %s47_s28  ;;  %s689_s30 = int_to_ptr.vmem [resolvable:$true] %s61_s30 }
  0x26   :  { %s531_s10 = scalar_lea.hbm %s759_s3, 512 }
  0x27   :  { %p532_p2 = scmp.ne.s32.totalorder %s759_s3, %s531_s10  ;;  %p535_p3 = scmp.lt.u32.totalorder %s531_s10, %s759_s3 }
  0x29   :  { %p537_p4 = pnand %p535_p3, %p532_p2 }
  0x2b   :  { %540 = shalt.err (!%p537_p4)
}
  0x2c   :  { %s541_s0 = scalar_lea.vmem %s48_s28, 512  ;;  %p546_p6 = scmp.lt.s32.totalorder %s48_s28, %s48_s28 }
  0x2d   :  { %p542_p5 = scmp.ne.s32.totalorder %s48_s28, %s541_s0  ;;  %p547_p7 = scmp.lt.s32.totalorder %s541_s0, %s541_s0 }
  0x2f   :  { %p548_p8 = por %p547_p7, %p546_p6 }
  0x31   :  { %p549_p9 = pnand %p548_p8, %p542_p5 }
  0x33   :  { %552 = shalt.err (!%p549_p9)
}
  0x34   :  { %53 = dma.hbm_to_vmem [thread:$0]  %s759_s3, 512, %s48_s28, [#allocation6], %s607_s13, %s607_s13, %s608_s14  }
  0x35   :  { %s553_s20 = scalar_lea.hbm %s761_s5, 512 }
  0x36   :  { %p554_p10 = scmp.ne.s32.totalorder %s761_s5, %s553_s20  ;;  %p557_p11 = scmp.lt.u32.totalorder %s553_s20, %s761_s5 }
  0x38   :  { %p559_p12 = pnand %p557_p11, %p554_p10 }
  0x3a   :  { %562 = shalt.err (!%p559_p12)
}
  0x3b   :  { %s563_s1 = scalar_lea.vmem %s689_s30, 512  ;;  %p568_p0 = scmp.lt.s32.totalorder %s689_s30, %s689_s30 }
  0x3c   :  { %p564_p13 = scmp.ne.s32.totalorder %s689_s30, %s563_s1  ;;  %p569_p1 = scmp.lt.s32.totalorder %s563_s1, %s563_s1 }
  0x3e   :  { %p570_p2 = por %p569_p1, %p568_p0 }
  0x40   :  { %p571_p3 = pnand %p570_p2, %p564_p13 }
  0x42   :  { %574 = shalt.err (!%p571_p3)
}
  0x43   :  { %67 = dma.hbm_to_vmem [thread:$0]  %s761_s5, 512, %s689_s30, [#allocation9], %s607_s13, %s607_s13, %s608_s14  }
  0x44   :  { %597 = dma.done.wait [#allocation3], 256  }
  0x45   :  { %598 = vsyncadd [#allocation3], 4294967040 }
  0x46   :  { %599 = dma.done.wait [#allocation6], 1024  }
  0x47   :  { %600 = vsyncadd [#allocation6], 4294966272 }
  0x48   :  { %601 = dma.done.wait [#allocation9], 512  }
  0x49   :  { %602 = vsyncadd [#allocation9], 4294966784  ;;  %vm95_vm0 = vcmask 261120   ;;  %v84_v0 = vld [vmem:[#allocation5] sm:$0xff]  ;;  %v85_v1 = vld [vmem:[#allocation5 + $0x8] sm:$0xff]  ;;  %s611_s8 = smov [#allocation10]  }
  0x4a   :  { %v86_v2 = vld [vmem:[#allocation5 + $0x10] sm:$0xff]  ;;  %v452_v3 = vpack.c.bf16 %v85_v1, %v84_v0  ;;  %v87_v4 = vld [vmem:[#allocation5 + $0x18] sm:$0xff]  ;;  %v187_v8 = vld [vmem:[#allocation7] sm:$0xff]  ;;  %s378_s9 = sshll.u32 %s611_s8, 4  ;;  %s379_s9 = int_to_ptr.vmem [resolvable:$true] %s378_s9 }
  0x4b   :  { %v82_v5 = vld [vmem:[#allocation2] sm:$0xff]  ;;  %v456_v6 = vpack.c.bf16 %v87_v4, %v86_v2  ;;  %v83_v7 = vld [vmem:[#allocation2 + $0x8] sm:$0xff]  ;;  %v188_v9 = vld [vmem:[#allocation7 + $0x8] sm:$0xff]  ;;  %p580_p5 = scmp.lt.s32.totalorder %s379_s9, %s379_s9 }
  0x4c   :  { %427 = vmatprep.mubr.msk.f32.mxu0 %vm95_vm0, %v82_v5  ;;  %453 = vmatprep.subr.bf16.mxu0 %v452_v3  ;;  %v460_v10 = vpack.c.bf16 %v188_v9, %v187_v8  ;;  %v189_v11 = vld [vmem:[#allocation7 + $0x10] sm:$0xff]  ;;  %v190_v12 = vld [vmem:[#allocation7 + $0x18] sm:$0xff]  ;;  %v279_v14 = vld [vmem:[#allocation8] sm:$0xff] }
  0x4d   :  { %455 = vmatpush3.bf16.msra.mxu0 %v452_v3  ;;  %v464_v13 = vpack.c.bf16 %v190_v12, %v189_v11  ;;  %v280_v15 = vld [vmem:[#allocation8 + $0x8] sm:$0xff]  ;;  %v392_v17 = vld [vmem:[%s758_s2] ss:$0 sm:$0xff]  ;;  %v282_v33 = vld [vmem:[#allocation8 + $0x18] sm:$0xff] }
  0x4e   :  { %457 = vmatprep.subr.bf16.mxu0 %v456_v6  ;;  %461 = vmatprep.subr.bf16.mxu1 %v460_v10  ;;  %v468_v16 = vpack.c.bf16 %v280_v15, %v279_v14  ;;  %v281_v32 = vld [vmem:[#allocation8 + $0x10] sm:$0xff] }
  0x4f   :  { %463 = vmatpush3.bf16.msra.mxu1 %v460_v10  ;;  %v472_v34 = vpack.c.bf16 %v282_v33, %v281_v32  ;;  %v395_v35 = vld [vmem:[%s760_s4] ss:$0 sm:$0xff]  ;;  %s575_s4 = scalar_lea.vmem %s379_s9, 256 }
  0x50   :  { %465 = vmatprep.subr.bf16.mxu1 %v464_v13  ;;  %v398_v40 = vld [vmem:[%s762_s6] ss:$0 sm:$0xff]  ;;  %p576_p4 = scmp.ne.s32.totalorder %s379_s9, %s575_s4  ;;  %p581_p6 = scmp.lt.s32.totalorder %s575_s4, %s575_s4 }
  0x51   :  { %459 = vmatpush3.bf16.msra.mxu0 %v456_v6 }
  0x52   :  { %469 = vmatprep.subr.bf16.mxu0 %v468_v16  ;;  %p582_p7 = por %p581_p6, %p580_p5 }
  0x53   :  { %467 = vmatpush3.bf16.msra.mxu1 %v464_v13 }
  0x54   :  { %428 = vmatmul.mubr.msk.f32.vlgmr.msra.gmra.mrb[0].mxu0 %vm95_vm0, %v83_v7  ;;  %p583_p8 = pnand %p582_p7, %p576_p4 }
  0x55   :  { %471 = vmatpush3.bf16.msra.mxu0 %v468_v16 }
  0x56   :  { %473 = vmatprep.subr.bf16.mxu0 %v472_v34 }
  0x59   :  { %475 = vmatpush3.bf16.msra.mxu0 %v472_v34 }
 0x127   :  { %v429_v18 = vpop.f32.mrb[0].mxu0 }
 0x128   :  { %v174_v19 = vadd.f32 %v429_v18, %v392_v17  ;;  %v168_v20 = vpop.f32.mrb[1].mxu0 }
 0x129   :  { %v169_v21 = vadd.f32 %v392_v17, %v168_v20 }
 0x12a   :  { %v180_v22 = vmul.f32 0.70710677, %v174_v19  ;;  %v178_v29 = vmul.f32 0.5, %v174_v19 }
 0x12b   :  { %v179_v23 = vmul.f32 0.70710677, %v169_v21  ;;  %v177_v27 = vmul.f32 0.5, %v169_v21 }
 0x12c   :  { %483 = verf.f32 %v180_v22 }
 0x12d   :  { %485 = verf.f32 %v179_v23 }
 0x136   :  { %v484_v24 = vpop.eup %483 }
 0x137   :  { %v486_v25 = vpop.eup %485  ;;  %v184_v26 = vadd.f32 1.0, %v484_v24 }
 0x138   :  { %v183_v28 = vadd.f32 1.0, %v486_v25 }
 0x139   :  { %v186_v31 = vmul.f32 %v184_v26, %v178_v29 }
 0x13a   :  { %v185_v30 = vmul.f32 %v183_v28, %v177_v27 }
 0x13c   :  { %438 = vmatprep.mubr.msk.f32.mxu1 %vm95_vm0, %v185_v30 }
 0x13d   :  { %439 = vmatmul.mubr.msk.f32.vlgmr.msra.gmra.mrb[0].mxu1 %vm95_vm0, %v186_v31 }
 0x210   :  { %v440_v36 = vpop.f32.mrb[0].mxu1 }
 0x211   :  { %v270_v37 = vpop.f32.mrb[1].mxu1  ;;  %v276_v39 = vadd.f32 %v440_v36, %v395_v35 }
 0x212   :  { %v271_v38 = vadd.f32 %v395_v35, %v270_v37 }
 0x214   :  { %449 = vmatprep.mubr.msk.f32.mxu0 %vm95_vm0, %v271_v38 }
 0x215   :  { %450 = vmatmul.mubr.msk.f32.vlgmr.msra.gmra.mrb[2].mxu0 %vm95_vm0, %v276_v39 }
 0x2e8   :  { %v451_v41 = vpop.f32.mrb[2].mxu0 }
 0x2e9   :  { %v368_v42 = vadd.f32 %v451_v41, %v398_v40  ;;  %v362_v43 = vpop.f32.mrb[3].mxu0 }
 0x2ea   :  { %v363_v44 = vadd.f32 %v398_v40, %v362_v43 }
 0x2eb   :  { %372 = vst [vmem:[#allocation10 + $0x8] sm:$0xff] %v368_v42 }
 0x2ec   :  { %371 = vst [vmem:[#allocation10] sm:$0xff] %v363_v44 }
 0x2ed   :  { %586 = shalt.err (!%p583_p8)
}
 0x2ee   :  { %s587_s6 = scalar_lea.hbm %s763_s7, 256 }
 0x2ef   :  { %p588_p9 = scmp.ne.s32.totalorder %s763_s7, %s587_s6  ;;  %p591_p10 = scmp.lt.u32.totalorder %s587_s6, %s763_s7 }
 0x2f1   :  { %p593_p11 = pnand %p591_p10, %p588_p9 }
 0x2f3   :  { %596 = shalt.err (!%p593_p11)
}
 0x2f4   :  { %384 = dma.vmem_to_hbm [thread:$0]  %s379_s9, 256, %s763_s7, [#allocation4], %s607_s13, %s607_s13, %s608_s14  }
 0x2f5   :  { %603 = dma.done.wait [#allocation4], 256  }
 0x2f6   :  { %604 = vsyncadd [#allocation4], 4294967040 }
 0x2f7   :  { %388 = vsyncpa [#allocation3], 1 }
 0x2f8   :  { %389 = vsyncpa [#allocation6], 1 }
 0x2f9   :  { %390 = vsyncpa [#allocation9], 1 }
 0x2fa   :  { %391 = vsyncpa [#allocation4], 1 }

</bundles_post_ra>
